<compile_context>
chip_gen: v7x
topology: tpu7x:2x2x1
jax: 0.10.0
libtpu: 0.0.40
codegen_flags: <defaults>
</compile_context>

<pallas_src>
import functools

import jax
import jax.numpy as jnp
from jax import lax
from jax.experimental import pallas as pl
from jax.experimental.pallas import tpu as pltpu

_LANE = 128
_SUBLANE = 8
_MAX_BATCH_BLOCK = 2048      # rows per grid step (review: 256 was far too small)
_MIN_ROWS_PER_SPLIT = 512    # keep >=512 rows/block when forcing a 2-step grid


def _round_up(n, m):
    return (n + m - 1) // m * m


def _cdiv(a, b):
    return -(-a // b)


def _gelu_exact(x):
    # PyTorch nn.GELU() default: exact erf-based GELU (kept for module fidelity;
    # the tanh approximation would move work from VALU to the idle EUP slot but
    # drifts numerically from nn.GELU()).
    return 0.5 * x * (1.0 + lax.erf(x * 0.7071067811865476))


def _mlp_kernel(x_ref, w1_ref, b1_ref, w2_ref, b2_ref, w3_ref, b3_ref, o_ref):
    # bf16 MXU operands (native dtype on v5e/v6e/v7x), f32 accumulation.
    x = x_ref[...].astype(jnp.bfloat16)                       # (TB, D_in)

    # Layer 1: Linear + GELU   (Dropout = identity in eval)
    h1 = jnp.dot(x, w1_ref[...], preferred_element_type=jnp.float32) + b1_ref[...]
    h1 = _gelu_exact(h1)

    # Layer 2: Linear + GELU
    h2 = jnp.dot(h1.astype(jnp.bfloat16), w2_ref[...],
                 preferred_element_type=jnp.float32) + b2_ref[...]
    h2 = _gelu_exact(h2)

    # Layer 3: Linear (final Dropout = identity in eval)
    out = jnp.dot(h2.astype(jnp.bfloat16), w3_ref[...],
                  preferred_element_type=jnp.float32) + b3_ref[...]
    o_ref[...] = out.astype(o_ref.dtype)


def _choose_batch_tiling(B, block_b):
    """Adaptive batch tile: minimal padding, sublane-aligned, v7x-friendly grid."""
    n_blocks = _cdiv(B, block_b)
    # v7x has 2 TensorCores; guarantee >= 2 grid steps once each block can still
    # hold >= _MIN_ROWS_PER_SPLIT rows (keeps per-block DMA efficiency high, so
    # the extra grid step is ~free on single-TC v5e/v6e).
    if n_blocks == 1 and B >= 2 * _MIN_ROWS_PER_SPLIT:
        n_blocks = 2
    tb = _round_up(_cdiv(B, n_blocks), _SUBLANE)
    return tb, tb * n_blocks


@functools.partial(jax.jit, static_argnames=("block_b",))
def classifier_forward(x, w1, b1, w2, b2, w3, b3, *, block_b=_MAX_BATCH_BLOCK):
    B, d_in = x.shape
    out_dim = w3.shape[1]

    # Hidden feature dims padded to full 128-lane width (exact: padded weight
    # rows/cols and biases are 0 and GELU(0)=0).  Input/output feature dims are
    # left at their logical sizes: blocks equal to the full array dim satisfy
    # the (8,128) rule, and this removes the wrapper-side jnp.pad of x and the
    # 128-wide output writeback + slice pass flagged by the review.
    h1_p = _round_up(w1.shape[1], _LANE)
    h2_p = _round_up(w2.shape[1], _LANE)

    tb, b_p = _choose_batch_tiling(B, block_b)

    def pad2(a, rows, cols):
        return jnp.pad(a, ((0, rows - a.shape[0]), (0, cols - a.shape[1])))

    bf16 = jnp.bfloat16
    w1p = pad2(w1, d_in, h1_p).astype(bf16)
    w2p = pad2(w2, h1_p, h2_p).astype(bf16)
    w3p = pad2(w3, h2_p, out_dim).astype(bf16)
    b1p = pad2(b1.reshape(1, -1), 1, h1_p)            # biases stay f32
    b2p = pad2(b2.reshape(1, -1), 1, h2_p)
    b3p = b3.reshape(1, -1)

    # Batch padding only when needed (< 8 rows per block of waste by construction).
    xp = jnp.pad(x, ((0, b_p - B), (0, 0))) if b_p > B else x

    grid = (b_p // tb,)

    def resident(arr):
        # Tiny weight/bias arrays: whole array VMEM-resident across all blocks.
        return pl.BlockSpec(arr.shape, lambda i: (0, 0))

    out_p = pl.pallas_call(
        _mlp_kernel,
        out_shape=jax.ShapeDtypeStruct((b_p, out_dim), jnp.float32),
        grid=grid,
        in_specs=[
            pl.BlockSpec((tb, d_in), lambda i: (i, 0)),   # x: tiled over batch
            resident(w1p), resident(b1p),
            resident(w2p), resident(b2p),
            resident(w3p), resident(b3p),
        ],
        out_specs=pl.BlockSpec((tb, out_dim), lambda i: (i, 0)),
        compiler_params=pltpu.CompilerParams(
            dimension_semantics=("parallel",),   # v7x: shard batch across 2 TCs
        ),
    )(xp, w1p, b1p, w2p, b2p, w3p, b3p)

    return out_p[:B] if b_p > B else out_p


def init_params(key, input_dim=32, d=(64, 64), output_dim=2):
    dims = [input_dim] + list(d) + [output_dim]
    params = []
    for i in range(len(dims) - 1):
        key, kw, kb = jax.random.split(key, 3)
        bound = 1.0 / jnp.sqrt(dims[i])
        # Mimics torch.nn.Linear's uniform(-1/sqrt(fan_in), 1/sqrt(fan_in)) init.
        w = jax.random.uniform(kw, (dims[i], dims[i + 1]), jnp.float32, -bound, bound)
        b = jax.random.uniform(kb, (1, dims[i + 1]), jnp.float32, -bound, bound)
        params += [w, b]
    return params


def reference_forward(x, w1, b1, w2, b2, w3, b3):
    # Pure-JAX reference with the same bf16-operand / f32-accumulate numerics.
    bf16 = jnp.bfloat16
    h1 = _gelu_exact(jnp.dot(x.astype(bf16), w1.astype(bf16),
                             preferred_element_type=jnp.float32) + b1.reshape(1, -1))
    h2 = _gelu_exact(jnp.dot(h1.astype(bf16), w2.astype(bf16),
                             preferred_element_type=jnp.float32) + b2.reshape(1, -1))
    return jnp.dot(h2.astype(bf16), w3.astype(bf16),
                   preferred_element_type=jnp.float32) + b3.reshape(1, -1)


if __name__ == "__main__":
    key = jax.random.PRNGKey(0)
    key, kx = jax.random.split(key)

    B, input_dim = 8, 32
    x = jax.random.normal(kx, (B, input_dim), dtype=jnp.float32)

    w1, b1, w2, b2, w3, b3 = init_params(
        key, input_dim=input_dim, d=(64, 64), output_dim=2)

    out = classifier_forward(x, w1, b1, w2, b2, w3, b3)
    out = jax.block_until_ready(out)

    ref = reference_forward(x, w1, b1, w2, b2, w3, b3)
    assert out.shape == (B, 2), out.shape
    # Kernel and reference use identical bf16-operand / f32-accumulate math, so
    # agreement is expected at ~1e-6; tolerance leaves margin for op ordering.
    assert jnp.allclose(out, ref, atol=1e-3, rtol=1e-3), \
        float(jnp.max(jnp.abs(out - ref)))

    print("KERNEL_OK")
</pallas_src>

<mosaic_0001>
module attributes {stable_mosaic.version = 11 : i64} {
  func.func @_mlp_kernel(%arg0: i32, %arg1: memref<8x32xf32, #tpu.memory_space<vmem>>, %arg2: memref<32x128xbf16, #tpu.memory_space<vmem>>, %arg3: memref<1x128xf32, #tpu.memory_space<vmem>>, %arg4: memref<128x128xbf16, #tpu.memory_space<vmem>>, %arg5: memref<1x128xf32, #tpu.memory_space<vmem>>, %arg6: memref<128x2xbf16, #tpu.memory_space<vmem>>, %arg7: memref<1x2xf32, #tpu.memory_space<vmem>>, %arg8: memref<8x2xf32, #tpu.memory_space<vmem>>) attributes {dimension_semantics = [#tpu.dimension_semantics<parallel>], iteration_bounds = array<i64: 1>, scalar_prefetch = 0 : i64, scratch_operands = 0 : i64, tpu.core_type = #tpu.core_type<tc>, window_params = [{transform_indices = @transform_0, window_bounds = array<i64: 8, 32>}, {pipeline_mode = #tpu.pipeline_mode<synchronous>, transform_indices = @transform_1, window_bounds = array<i64: 32, 128>}, {pipeline_mode = #tpu.pipeline_mode<synchronous>, transform_indices = @transform_2, window_bounds = array<i64: 1, 128>}, {pipeline_mode = #tpu.pipeline_mode<synchronous>, transform_indices = @transform_3, window_bounds = array<i64: 128, 128>}, {pipeline_mode = #tpu.pipeline_mode<synchronous>, transform_indices = @transform_4, window_bounds = array<i64: 1, 128>}, {pipeline_mode = #tpu.pipeline_mode<synchronous>, transform_indices = @transform_5, window_bounds = array<i64: 128, 2>}, {pipeline_mode = #tpu.pipeline_mode<synchronous>, transform_indices = @transform_6, window_bounds = array<i64: 1, 2>}, {transform_indices = @transform_7, window_bounds = array<i64: 8, 2>}]} {
    %c0 = arith.constant 0 : index
    %c0_0 = arith.constant 0 : index
    %0 = vector.load %arg1[%c0, %c0_0] : memref<8x32xf32, #tpu.memory_space<vmem>>, vector<8x32xf32>
    %1 = arith.truncf %0 : vector<8x32xf32> to vector<8x32xbf16>
    %c0_1 = arith.constant 0 : index
    %c0_2 = arith.constant 0 : index
    %2 = vector.load %arg2[%c0_1, %c0_2] : memref<32x128xbf16, #tpu.memory_space<vmem>>, vector<32x128xbf16>
    %cst = arith.constant dense<0.000000e+00> : vector<8x128xf32>
    %3 = tpu.matmul %1, %2, %cst {dimension_numbers = #tpu.dot_dimension_numbers<[1], [0], [0], [1], [0, 0, 1, 1], [], []>} : vector<8x32xbf16>, vector<32x128xbf16>, vector<8x128xf32> -> vector<8x128xf32>
    %c0_3 = arith.constant 0 : index
    %c0_4 = arith.constant 0 : index
    %4 = vector.load %arg3[%c0_3, %c0_4] : memref<1x128xf32, #tpu.memory_space<vmem>>, vector<1x128xf32>
    %5 = vector.broadcast %4 : vector<1x128xf32> to vector<8x128xf32>
    %6 = arith.addf %3, %5 : vector<8x128xf32>
    %cst_5 = arith.constant 5.000000e-01 : f32
    %7 = vector.broadcast %cst_5 : f32 to vector<8x128xf32>
    %8 = arith.mulf %7, %6 : vector<8x128xf32>
    %cst_6 = arith.constant 0.707106769 : f32
    %9 = vector.broadcast %cst_6 : f32 to vector<8x128xf32>
    %10 = arith.mulf %6, %9 : vector<8x128xf32>
    %11 = math.erf %10 : vector<8x128xf32>
    %cst_7 = arith.constant 1.000000e+00 : f32
    %12 = vector.broadcast %cst_7 : f32 to vector<8x128xf32>
    %13 = arith.addf %12, %11 : vector<8x128xf32>
    %14 = arith.mulf %8, %13 : vector<8x128xf32>
    %15 = arith.truncf %14 : vector<8x128xf32> to vector<8x128xbf16>
    %c0_8 = arith.constant 0 : index
    %c0_9 = arith.constant 0 : index
    %16 = vector.load %arg4[%c0_8, %c0_9] : memref<128x128xbf16, #tpu.memory_space<vmem>>, vector<128x128xbf16>
    %cst_10 = arith.constant dense<0.000000e+00> : vector<8x128xf32>
    %17 = tpu.matmul %15, %16, %cst_10 {dimension_numbers = #tpu.dot_dimension_numbers<[1], [0], [0], [1], [0, 0, 1, 1], [], []>} : vector<8x128xbf16>, vector<128x128xbf16>, vector<8x128xf32> -> vector<8x128xf32>
    %c0_11 = arith.constant 0 : index
    %c0_12 = arith.constant 0 : index
    %18 = vector.load %arg5[%c0_11, %c0_12] : memref<1x128xf32, #tpu.memory_space<vmem>>, vector<1x128xf32>
    %19 = vector.broadcast %18 : vector<1x128xf32> to vector<8x128xf32>
    %20 = arith.addf %17, %19 : vector<8x128xf32>
    %cst_13 = arith.constant 5.000000e-01 : f32
    %21 = vector.broadcast %cst_13 : f32 to vector<8x128xf32>
    %22 = arith.mulf %21, %20 : vector<8x128xf32>
    %cst_14 = arith.constant 0.707106769 : f32
    %23 = vector.broadcast %cst_14 : f32 to vector<8x128xf32>
    %24 = arith.mulf %20, %23 : vector<8x128xf32>
    %25 = math.erf %24 : vector<8x128xf32>
    %cst_15 = arith.constant 1.000000e+00 : f32
    %26 = vector.broadcast %cst_15 : f32 to vector<8x128xf32>
    %27 = arith.addf %26, %25 : vector<8x128xf32>
    %28 = arith.mulf %22, %27 : vector<8x128xf32>
    %29 = arith.truncf %28 : vector<8x128xf32> to vector<8x128xbf16>
    %c0_16 = arith.constant 0 : index
    %c0_17 = arith.constant 0 : index
    %30 = vector.load %arg6[%c0_16, %c0_17] : memref<128x2xbf16, #tpu.memory_space<vmem>>, vector<128x2xbf16>
    %cst_18 = arith.constant dense<0.000000e+00> : vector<8x2xf32>
    %31 = tpu.matmul %29, %30, %cst_18 {dimension_numbers = #tpu.dot_dimension_numbers<[1], [0], [0], [1], [0, 0, 1, 1], [], []>} : vector<8x128xbf16>, vector<128x2xbf16>, vector<8x2xf32> -> vector<8x2xf32>
    %c0_19 = arith.constant 0 : index
    %c0_20 = arith.constant 0 : index
    %32 = vector.load %arg7[%c0_19, %c0_20] : memref<1x2xf32, #tpu.memory_space<vmem>>, vector<1x2xf32>
    %33 = vector.broadcast %32 : vector<1x2xf32> to vector<8x2xf32>
    %34 = arith.addf %31, %33 : vector<8x2xf32>
    %c0_21 = arith.constant 0 : index
    %c0_22 = arith.constant 0 : index
    %35 = vector.load %arg8[%c0_21, %c0_22] : memref<8x2xf32, #tpu.memory_space<vmem>>, vector<8x2xf32>
    tpu.vector_store %arg8[%c0_21, %c0_22], %34 {strides = array<i32>} : memref<8x2xf32, #tpu.memory_space<vmem>>, vector<8x2xf32>,
    return
  }
  func.func @transform_0(%arg0: i32) -> (i32, i32) {
    %c0_i32 = arith.constant 0 : i32
    %c0_i32_0 = arith.constant 0 : i32
    return %arg0, %c0_i32 : i32, i32
  }
  func.func @transform_1(%arg0: i32) -> (i32, i32) {
    %c0_i32 = arith.constant 0 : i32
    %c0_i32_0 = arith.constant 0 : i32
    %c0_i32_1 = arith.constant 0 : i32
    return %c0_i32, %c0_i32_0 : i32, i32
  }
  func.func @transform_2(%arg0: i32) -> (i32, i32) {
    %c0_i32 = arith.constant 0 : i32
    %c0_i32_0 = arith.constant 0 : i32
    %c0_i32_1 = arith.constant 0 : i32
    return %c0_i32, %c0_i32_0 : i32, i32
  }
  func.func @transform_3(%arg0: i32) -> (i32, i32) {
    %c0_i32 = arith.constant 0 : i32
    %c0_i32_0 = arith.constant 0 : i32
    %c0_i32_1 = arith.constant 0 : i32
    return %c0_i32, %c0_i32_0 : i32, i32
  }
  func.func @transform_4(%arg0: i32) -> (i32, i32) {
    %c0_i32 = arith.constant 0 : i32
    %c0_i32_0 = arith.constant 0 : i32
    %c0_i32_1 = arith.constant 0 : i32
    return %c0_i32, %c0_i32_0 : i32, i32
  }
  func.func @transform_5(%arg0: i32) -> (i32, i32) {
    %c0_i32 = arith.constant 0 : i32
    %c0_i32_0 = arith.constant 0 : i32
    %c0_i32_1 = arith.constant 0 : i32
    return %c0_i32, %c0_i32_0 : i32, i32
  }
  func.func @transform_6(%arg0: i32) -> (i32, i32) {
    %c0_i32 = arith.constant 0 : i32
    %c0_i32_0 = arith.constant 0 : i32
    %c0_i32_1 = arith.constant 0 : i32
    return %c0_i32, %c0_i32_0 : i32, i32
  }
  func.func @transform_7(%arg0: i32) -> (i32, i32) {
    %c0_i32 = arith.constant 0 : i32
    %c0_i32_0 = arith.constant 0 : i32
    return %arg0, %c0_i32 : i32, i32
  }
}

</mosaic_0001>

<bundles_post_ra>
// kernel: classifier_forward.1
= control target key start
LH: loop header
LB: loop body
LE: loop exit
PB: predicated region body
PF: predicated region fallthrough
CT: control target
= control target key end

     0   :  { %v451_v0 = vmov 0.0   ;;  %vm452_vm0 = vmmov 0   ;;  %vm52_vm1 = vcmask 261120   ;;  %vm330_vm2 = vcmask 15360   ;;  %s586_s1 = inlined_call_operand.vmem [shape: bf16[32,128], index: 1, kind: input, shape index: {}]   ;;  %s587_s0 = inlined_call_operand.vmem [shape: f32[8,32], index: 0, kind: input, shape index: {}]   ;;  %s588_s3 = inlined_call_operand.vmem [shape: bf16[128,128], index: 3, kind: input, shape index: {}]   ;;  %s589_s5 = inlined_call_operand.vmem [shape: bf16[128,2], index: 5, kind: input, shape index: {}]   ;;  %s590_s2 = inlined_call_operand.vmem [shape: f32[1,128], index: 2, kind: input, shape index: {}]   ;;  %s591_s4 = inlined_call_operand.vmem [shape: f32[1,128], index: 4, kind: input, shape index: {}]   ;;  %s592_s6 = inlined_call_operand.vmem [shape: f32[1,2], index: 6, kind: input, shape index: {}]   ;;  %s593_s7 = inlined_call_operand.vmem [shape: f32[8,2], index: 7, kind: output, shape index: {}]  }
   0x1   :  { %379 = vmatprep.subr.bf16.mxu0 %v451_v0  ;;  %v429_v1 = vld [vmem:[%s586_s1] sm:$0xff]   ;;  %383 = vmatprep.mubr.msk.bf16.mxu0 %vm452_vm0, %v451_v0  ;;  %v430_v2 = vld [vmem:[%s586_s1 + $0x8] sm:$0xff]   ;;  %v433_v7 = vld [vmem:[%s588_s3 + $0x10] sm:$0xff]  }
   0x2   :  { %387 = vmatprep.subr.bf16.mxu1 %v451_v0  ;;  %403 = vmatprep.mubr.msk.bf16.mxu1 %vm452_vm0, %v451_v0  ;;  %v27_v3 = vld [vmem:[%s587_s0] sm:$0xff]  ;;  %v432_v6 = vld [vmem:[%s588_s3 + $0x8] sm:$0xff]   ;;  %v434_v8 = vld [vmem:[%s588_s3 + $0x18] sm:$0xff]  }
   0x3   :  { %380 = vmatpush3.bf16.msra.mxu0 %v429_v1  ;;  %v431_v4 = vld [vmem:[%s588_s3] sm:$0xff]   ;;  %v28_v5 = vpack.c.bf16 %v27_v3, %v27_v3  ;;  %v436_v10 = vld [vmem:[%s588_s3 + $0x28] sm:$0xff]   ;;  %v437_v11 = vld [vmem:[%s588_s3 + $0x30] sm:$0xff]  }
   0x4   :  { %381 = vmatprep.subr.bf16.mxu0 %v451_v0  ;;  %388 = vmatpush3.bf16.msra.mxu1 %v431_v4  ;;  %v435_v9 = vld [vmem:[%s588_s3 + $0x20] sm:$0xff]   ;;  %v438_v12 = vld [vmem:[%s588_s3 + $0x38] sm:$0xff]   ;;  %v440_v14 = vld [vmem:[%s589_s5 + $0x8] sm:$0xff]  }
   0x5   :  { %389 = vmatprep.subr.bf16.mxu1 %v451_v0  ;;  %v439_v13 = vld [vmem:[%s589_s5] sm:$0xff]   ;;  %v441_v15 = vld [vmem:[%s589_s5 + $0x10] sm:$0xff]   ;;  %v442_v28 = vld [vmem:[%s589_s5 + $0x18] sm:$0xff]  }
   0x6   :  { %v336_v16 = vld [vmem:[%s590_s2] ss:$0 sm:$0xff]  ;;  %v444_v30 = vld [vmem:[%s589_s5 + $0x28] sm:$0xff]   ;;  %v445_v31 = vld [vmem:[%s589_s5 + $0x30] sm:$0xff]  }
   0x7   :  { %382 = vmatpush3.bf16.msra.mxu0 %v430_v2  ;;  %v443_v29 = vld [vmem:[%s589_s5 + $0x20] sm:$0xff]   ;;  %v446_v32 = vld [vmem:[%s589_s5 + $0x38] sm:$0xff]  }
   0x8   :  { %407 = vmatprep.subr.bf16.mxu0 %v451_v0  ;;  %390 = vmatpush3.bf16.msra.mxu1 %v432_v6  ;;  %v340_v33 = vld [vmem:[%s591_s4] ss:$0 sm:$0xff] }
   0x9   :  { %391 = vmatprep.subr.bf16.mxu1 %v451_v0  ;;  %v349_v45 = vld [vmem:[%s592_s6] ss:$0 sm:$0xff] }
   0xa   :  { %384 = vmatmul.mubr.msk.bf16.vlgmr.msra.gmra.mrb[0].mxu0 %vm52_vm1, %v28_v5 }
   0xb   :  { %423 = vmatprep.mubr.msk.bf16.mxu0 %vm452_vm0, %v451_v0  ;;  %408 = vmatpush3.bf16.msra.mxu0 %v439_v13 }
   0xc   :  { %392 = vmatpush3.bf16.msra.mxu1 %v433_v7  ;;  %409 = vmatprep.subr.bf16.mxu0 %v451_v0 }
   0xd   :  { %393 = vmatprep.subr.bf16.mxu1 %v451_v0 }
   0xf   :  { %410 = vmatpush3.bf16.msra.mxu0 %v440_v14 }
  0x10   :  { %394 = vmatpush3.bf16.msra.mxu1 %v434_v8  ;;  %411 = vmatprep.subr.bf16.mxu0 %v451_v0 }
  0x11   :  { %395 = vmatprep.subr.bf16.mxu1 %v451_v0 }
  0x13   :  { %412 = vmatpush3.bf16.msra.mxu0 %v441_v15 }
  0x14   :  { %396 = vmatpush3.bf16.msra.mxu1 %v435_v9  ;;  %413 = vmatprep.subr.bf16.mxu0 %v451_v0 }
  0x15   :  { %397 = vmatprep.subr.bf16.mxu1 %v451_v0 }
  0x17   :  { %414 = vmatpush3.bf16.msra.mxu0 %v442_v28 }
  0x18   :  { %398 = vmatpush3.bf16.msra.mxu1 %v436_v10  ;;  %415 = vmatprep.subr.bf16.mxu0 %v451_v0 }
  0x19   :  { %399 = vmatprep.subr.bf16.mxu1 %v451_v0 }
  0x1b   :  { %416 = vmatpush3.bf16.msra.mxu0 %v443_v29 }
  0x1c   :  { %400 = vmatpush3.bf16.msra.mxu1 %v437_v11  ;;  %417 = vmatprep.subr.bf16.mxu0 %v451_v0 }
  0x1d   :  { %401 = vmatprep.subr.bf16.mxu1 %v451_v0 }
  0x1f   :  { %418 = vmatpush3.bf16.msra.mxu0 %v444_v30 }
  0x20   :  { %402 = vmatpush3.bf16.msra.mxu1 %v438_v12  ;;  %419 = vmatprep.subr.bf16.mxu0 %v451_v0 }
  0x23   :  { %420 = vmatpush3.bf16.msra.mxu0 %v445_v31 }
  0x24   :  { %421 = vmatprep.subr.bf16.mxu0 %v451_v0 }
  0x27   :  { %422 = vmatpush3.bf16.msra.mxu0 %v446_v32 }
  0xdd   :  { %v90_v17 = vpop.f32.mrb[0].mxu0 }
  0xde   :  { %v91_v18 = vadd.f32 %v336_v16, %v90_v17  ;;  %v385_v19 = vpop.f32.mrb[1].mxu0 }
  0xdf   :  { %v93_v20 = vpop.f32.mrb[2].mxu0 }
  0xe0   :  { %v97_v21 = vmul.f32 0.70710677, %v91_v18  ;;  %v386_v22 = vpop.f32.mrb[3].mxu0  ;;  %v96_v24 = vmul.f32 0.5, %v91_v18 }
  0xe2   :  { %447 = verf.f32 %v97_v21 }
  0xec   :  { %v448_v23 = vpop.eup %447 }
  0xed   :  { %v99_v25 = vadd.f32 1.0, %v448_v23 }
  0xef   :  { %v100_v26 = vmul.f32 %v99_v25, %v96_v24 }
  0xf1   :  { %v101_v27 = vpack.c.bf16 %v100_v26, %v100_v26 }
  0xf3   :  { %404 = vmatmul.mubr.bf16.vlgmr.msra.gmra.mrb[0].mxu1 %v101_v27 }
 0x1c6   :  { %v207_v34 = vpop.f32.mrb[0].mxu1 }
 0x1c7   :  { %v208_v35 = vadd.f32 %v340_v33, %v207_v34  ;;  %v405_v36 = vpop.f32.mrb[1].mxu1 }
 0x1c8   :  { %v210_v37 = vpop.f32.mrb[2].mxu1 }
 0x1c9   :  { %v214_v38 = vmul.f32 0.70710677, %v208_v35  ;;  %v406_v39 = vpop.f32.mrb[3].mxu1  ;;  %v213_v41 = vmul.f32 0.5, %v208_v35 }
 0x1cb   :  { %449 = verf.f32 %v214_v38 }
 0x1d5   :  { %v450_v40 = vpop.eup %449 }
 0x1d6   :  { %v216_v42 = vadd.f32 1.0, %v450_v40 }
 0x1d8   :  { %v217_v43 = vmul.f32 %v216_v42, %v213_v41 }
 0x1da   :  { %v218_v44 = vpack.c.bf16 %v217_v43, %v217_v43 }
 0x1dc   :  { %424 = vmatmul.mubr.bf16.vlgmr.msra.gmra.mrb[4].mxu0 %v218_v44 }
 0x2af   :  { %v324_v46 = vpop.f32.mrb[4].mxu0 }
 0x2b0   :  { %v325_v47 = vadd.f32 %v349_v45, %v324_v46  ;;  %v425_v48 = vpop.f32.mrb[5].mxu0 }
 0x2b1   :  { %v327_v49 = vpop.f32.mrb[6].mxu0 }
 0x2b2   :  { %331 = vst.msk [vmem:[%s593_s7] sm:$0xff] %vm330_vm2, %v325_v47  ;;  %v426_v50 = vpop.f32.mrb[7].mxu0 }

</bundles_post_ra>
